<compile_context>
chip_gen: v6e
topology: v6e:2x2x1
jax: 0.10.0
libtpu: 0.0.40
codegen_flags: <defaults>
</compile_context>

<pallas_src>
import functools

import jax
import jax.numpy as jnp
from jax.experimental import pallas as pl
from jax.experimental.pallas import tpu as pltpu

F_PAD = 128     # lane-dense padded feature width
ROW_TILE = 16   # sublane tile for bf16 operands


def _round_up(n, m):
    return (n + m - 1) // m * m


# ----------------------------- Pallas kernel -------------------------------
def _gcn_fused_kernel(*refs, n_layers):
    """Fused multi-layer GraphConv:  H <- relu?(A_i @ H @ W_i + b_i) per layer.

    refs layout:
      [A_0 .. A_{L-1}, H_in, W_0, b_0, .., W_{L-1}, b_{L-1}, O]
    A_i / H / W_i are pre-padded bf16 (MXU-native); b_i is f32; accumulation
    and the bias/ReLU epilogue are f32. The activation is carried as a traced
    value between layers — no VMEM scratch round-trip.
    """
    a_refs = refs[:n_layers]
    h_ref = refs[n_layers]
    wb_refs = refs[n_layers + 1: 3 * n_layers + 1]
    w_refs = wb_refs[0::2]
    b_refs = wb_refs[1::2]
    o_ref = refs[3 * n_layers + 1]

    h = h_ref[...]  # bf16, read once
    for i in range(n_layers):
        # (A @ H) @ W — with features padded to 128 both association orders
        # cost the same, so keep aggregation first.
        ah = jnp.dot(a_refs[i][...], h, preferred_element_type=jnp.float32)
        out = jnp.dot(ah.astype(jnp.bfloat16), w_refs[i][...],
                      preferred_element_type=jnp.float32)
        out = out + b_refs[i][...]  # f32 epilogue (bias broadcasts over rows)

        if i != n_layers - 1:
            out = jnp.maximum(out, 0.0)      # ReLU; dropout identity in eval
            h = out.astype(jnp.bfloat16)     # carry as a value, not a scratch
        else:
            o_ref[...] = out.astype(o_ref.dtype)


# --------------------------- one-time preparation ---------------------------
def prepare_gcn_params(params, *, f_pad=F_PAD):
    """Pad W/b to lane-dense width and quantize W to bf16 ONCE (hoisted out of
    the per-forward path)."""
    prepared = []
    for (w, b) in params:
        w_p = jnp.pad(
            w, ((0, f_pad - w.shape[0]), (0, f_pad - w.shape[1]))
        ).astype(jnp.bfloat16)
        b_p = jnp.pad(b, ((0, 0), (0, f_pad - b.shape[1]))).astype(jnp.float32)
        prepared.append((w_p, b_p))
    return prepared


def prepare_graph_inputs(blocks, h, *, f_pad=F_PAD, row_tile=ROW_TILE):
    """Pad features to 128 lanes, node counts to a multiple of 16 rows, and
    cast A / H to bf16 (fused into the pad that already writes new arrays)."""
    node_counts = [h.shape[0]] + [a.shape[0] for a in blocks]
    padded_counts = [_round_up(n, row_tile) for n in node_counts]

    h_p = jnp.pad(
        h, ((0, padded_counts[0] - h.shape[0]), (0, f_pad - h.shape[1]))
    ).astype(jnp.bfloat16)

    blocks_p = []
    for i, a in enumerate(blocks):
        a_p = jnp.pad(
            a, ((0, padded_counts[i + 1] - a.shape[0]),
                (0, padded_counts[i] - a.shape[1]))
        ).astype(jnp.bfloat16)
        blocks_p.append(a_p)
    return blocks_p, h_p, node_counts


# ------------------------------ forward -------------------------------------
@functools.partial(jax.jit, static_argnames=("n_dst", "out_size", "f_pad"))
def gcn_forward(blocks_p, h_p, params_p, *, n_dst, out_size, f_pad=F_PAD):
    """Whole GraphConv stack in a single pallas_call on pre-padded inputs."""
    num_layers = len(params_p)
    inputs = list(blocks_p) + [h_p]
    for (w_p, b_p) in params_p:
        inputs += [w_p, b_p]

    n_dst_pad = blocks_p[-1].shape[0]

    flops = sum(
        2 * (a.shape[0] * a.shape[1] * f_pad + a.shape[0] * f_pad * f_pad)
        for a in blocks_p)
    bytes_accessed = (sum(int(x.size) * x.dtype.itemsize for x in inputs)
                      + n_dst_pad * f_pad * 4)

    kernel = functools.partial(_gcn_fused_kernel, n_layers=num_layers)

    out_pad = pl.pallas_call(
        kernel,
        out_shape=jax.ShapeDtypeStruct((n_dst_pad, f_pad), jnp.float32),
        in_specs=[pl.BlockSpec(memory_space=pltpu.MemorySpace.VMEM)]
        * len(inputs),
        out_specs=pl.BlockSpec(memory_space=pltpu.MemorySpace.VMEM),
        cost_estimate=pl.CostEstimate(
            flops=flops, transcendentals=0, bytes_accessed=bytes_accessed),
    )(*inputs)
    return out_pad[:n_dst, :out_size]


# ------------------------------ glue (JAX) ---------------------------------
def normalize_block(adj):
    """DGL GraphConv norm='both' for a bipartite block adjacency [dst, src]."""
    out_deg = jnp.maximum(adj.sum(axis=0), 1.0)  # src out-degree
    in_deg = jnp.maximum(adj.sum(axis=1), 1.0)   # dst in-degree
    return adj * (in_deg[:, None] ** -0.5) * (out_deg[None, :] ** -0.5)


def init_gcn_params(key, in_size, hid_size, out_size, num_layers):
    """Xavier-uniform weights, zero biases (matches dgl.GraphConv defaults)."""
    sizes = []
    for i in range(num_layers):
        if num_layers == 1:
            sizes.append((in_size, out_size))
        elif i == 0:
            sizes.append((in_size, hid_size))
        elif i == num_layers - 1:
            sizes.append((hid_size, out_size))
        else:
            sizes.append((hid_size, hid_size))
    params = []
    for (fi, fo) in sizes:
        key, wk = jax.random.split(key)
        limit = (6.0 / (fi + fo)) ** 0.5
        w = jax.random.uniform(wk, (fi, fo), jnp.float32, -limit, limit)
        b = jnp.zeros((1, fo), jnp.float32)
        params.append((w, b))
    return params


# -------------------------------- main --------------------------------------
if __name__ == "__main__":
    key = jax.random.PRNGKey(0)

    in_size, hid_size, out_size, num_layers = 16, 32, 8, 3
    # Minibatch "blocks": bipartite adjacencies with shrinking dst frontiers.
    node_counts = [64, 48, 32, 16]  # src of layer i = node_counts[i], dst = node_counts[i+1]

    key, fk = jax.random.split(key)
    h = jax.random.normal(fk, (node_counts[0], in_size), jnp.float32)

    blocks = []
    for i in range(num_layers):
        n_src, n_dst = node_counts[i], node_counts[i + 1]
        key, ak = jax.random.split(key)
        adj = (jax.random.uniform(ak, (n_dst, n_src)) < 0.25).astype(jnp.float32)
        # ensure every dst node keeps a self-ish edge so degrees are sane
        adj = adj.at[jnp.arange(n_dst), jnp.arange(n_dst) % n_src].set(1.0)
        blocks.append(normalize_block(adj))

    params = init_gcn_params(key, in_size, hid_size, out_size, num_layers)

    # One-time preparation (hoisted pad + bf16 cast).
    params_p = prepare_gcn_params(params)
    blocks_p, h_p, counts = prepare_graph_inputs(blocks, h)

    out = gcn_forward(blocks_p, h_p, params_p,
                      n_dst=counts[-1], out_size=out_size)
    out = jax.block_until_ready(out)
    assert out.shape == (node_counts[-1], out_size), out.shape

    # Pure-JAX f32 reference check (kernel uses bf16 MXU inputs -> loose tol).
    ref = h
    for i, (a, (w, b)) in enumerate(zip(blocks, params)):
        ref = a @ ref @ w + b
        if i != num_layers - 1:
            ref = jnp.maximum(ref, 0.0)
    max_err = float(jnp.max(jnp.abs(out - ref)))
    assert jnp.allclose(out, ref, atol=5e-2, rtol=5e-2), max_err

    print("KERNEL_OK")
</pallas_src>

<mosaic_0001>
module attributes {stable_mosaic.version = 11 : i64} {
  func.func @_gcn_fused_kernel(%arg0: memref<48x64xbf16, #tpu.memory_space<vmem>>, %arg1: memref<32x48xbf16, #tpu.memory_space<vmem>>, %arg2: memref<16x32xbf16, #tpu.memory_space<vmem>>, %arg3: memref<64x128xbf16, #tpu.memory_space<vmem>>, %arg4: memref<128x128xbf16, #tpu.memory_space<vmem>>, %arg5: memref<1x128xf32, #tpu.memory_space<vmem>>, %arg6: memref<128x128xbf16, #tpu.memory_space<vmem>>, %arg7: memref<1x128xf32, #tpu.memory_space<vmem>>, %arg8: memref<128x128xbf16, #tpu.memory_space<vmem>>, %arg9: memref<1x128xf32, #tpu.memory_space<vmem>>, %arg10: memref<16x128xf32, #tpu.memory_space<vmem>>) attributes {dimension_semantics = [], scalar_prefetch = 0 : i64, scratch_operands = 0 : i64, tpu.core_type = #tpu.core_type<tc>} {
    %c0 = arith.constant 0 : index
    %c0_0 = arith.constant 0 : index
    %0 = vector.load %arg3[%c0, %c0_0] : memref<64x128xbf16, #tpu.memory_space<vmem>>, vector<64x128xbf16>
    %c0_1 = arith.constant 0 : index
    %c0_2 = arith.constant 0 : index
    %1 = vector.load %arg0[%c0_1, %c0_2] : memref<48x64xbf16, #tpu.memory_space<vmem>>, vector<48x64xbf16>
    %cst = arith.constant dense<0.000000e+00> : vector<48x128xf32>
    %2 = tpu.matmul %1, %0, %cst {dimension_numbers = #tpu.dot_dimension_numbers<[1], [0], [0], [1], [0, 0, 1, 1], [], []>} : vector<48x64xbf16>, vector<64x128xbf16>, vector<48x128xf32> -> vector<48x128xf32>
    %3 = arith.truncf %2 : vector<48x128xf32> to vector<48x128xbf16>
    %c0_3 = arith.constant 0 : index
    %c0_4 = arith.constant 0 : index
    %4 = vector.load %arg4[%c0_3, %c0_4] : memref<128x128xbf16, #tpu.memory_space<vmem>>, vector<128x128xbf16>
    %cst_5 = arith.constant dense<0.000000e+00> : vector<48x128xf32>
    %5 = tpu.matmul %3, %4, %cst_5 {dimension_numbers = #tpu.dot_dimension_numbers<[1], [0], [0], [1], [0, 0, 1, 1], [], []>} : vector<48x128xbf16>, vector<128x128xbf16>, vector<48x128xf32> -> vector<48x128xf32>
    %c0_6 = arith.constant 0 : index
    %c0_7 = arith.constant 0 : index
    %6 = vector.load %arg5[%c0_6, %c0_7] : memref<1x128xf32, #tpu.memory_space<vmem>>, vector<1x128xf32>
    %7 = vector.broadcast %6 : vector<1x128xf32> to vector<48x128xf32>
    %8 = arith.addf %5, %7 : vector<48x128xf32>
    %cst_8 = arith.constant 0.000000e+00 : f32
    %9 = vector.broadcast %cst_8 : f32 to vector<48x128xf32>
    %10 = arith.maximumf %8, %9 : vector<48x128xf32>
    %11 = arith.truncf %10 : vector<48x128xf32> to vector<48x128xbf16>
    %c0_9 = arith.constant 0 : index
    %c0_10 = arith.constant 0 : index
    %12 = vector.load %arg1[%c0_9, %c0_10] : memref<32x48xbf16, #tpu.memory_space<vmem>>, vector<32x48xbf16>
    %cst_11 = arith.constant dense<0.000000e+00> : vector<32x128xf32>
    %13 = tpu.matmul %12, %11, %cst_11 {dimension_numbers = #tpu.dot_dimension_numbers<[1], [0], [0], [1], [0, 0, 1, 1], [], []>} : vector<32x48xbf16>, vector<48x128xbf16>, vector<32x128xf32> -> vector<32x128xf32>
    %14 = arith.truncf %13 : vector<32x128xf32> to vector<32x128xbf16>
    %c0_12 = arith.constant 0 : index
    %c0_13 = arith.constant 0 : index
    %15 = vector.load %arg6[%c0_12, %c0_13] : memref<128x128xbf16, #tpu.memory_space<vmem>>, vector<128x128xbf16>
    %cst_14 = arith.constant dense<0.000000e+00> : vector<32x128xf32>
    %16 = tpu.matmul %14, %15, %cst_14 {dimension_numbers = #tpu.dot_dimension_numbers<[1], [0], [0], [1], [0, 0, 1, 1], [], []>} : vector<32x128xbf16>, vector<128x128xbf16>, vector<32x128xf32> -> vector<32x128xf32>
    %c0_15 = arith.constant 0 : index
    %c0_16 = arith.constant 0 : index
    %17 = vector.load %arg7[%c0_15, %c0_16] : memref<1x128xf32, #tpu.memory_space<vmem>>, vector<1x128xf32>
    %18 = vector.broadcast %17 : vector<1x128xf32> to vector<32x128xf32>
    %19 = arith.addf %16, %18 : vector<32x128xf32>
    %cst_17 = arith.constant 0.000000e+00 : f32
    %20 = vector.broadcast %cst_17 : f32 to vector<32x128xf32>
    %21 = arith.maximumf %19, %20 : vector<32x128xf32>
    %22 = arith.truncf %21 : vector<32x128xf32> to vector<32x128xbf16>
    %c0_18 = arith.constant 0 : index
    %c0_19 = arith.constant 0 : index
    %23 = vector.load %arg2[%c0_18, %c0_19] : memref<16x32xbf16, #tpu.memory_space<vmem>>, vector<16x32xbf16>
    %cst_20 = arith.constant dense<0.000000e+00> : vector<16x128xf32>
    %24 = tpu.matmul %23, %22, %cst_20 {dimension_numbers = #tpu.dot_dimension_numbers<[1], [0], [0], [1], [0, 0, 1, 1], [], []>} : vector<16x32xbf16>, vector<32x128xbf16>, vector<16x128xf32> -> vector<16x128xf32>
    %25 = arith.truncf %24 : vector<16x128xf32> to vector<16x128xbf16>
    %c0_21 = arith.constant 0 : index
    %c0_22 = arith.constant 0 : index
    %26 = vector.load %arg8[%c0_21, %c0_22] : memref<128x128xbf16, #tpu.memory_space<vmem>>, vector<128x128xbf16>
    %cst_23 = arith.constant dense<0.000000e+00> : vector<16x128xf32>
    %27 = tpu.matmul %25, %26, %cst_23 {dimension_numbers = #tpu.dot_dimension_numbers<[1], [0], [0], [1], [0, 0, 1, 1], [], []>} : vector<16x128xbf16>, vector<128x128xbf16>, vector<16x128xf32> -> vector<16x128xf32>
    %c0_24 = arith.constant 0 : index
    %c0_25 = arith.constant 0 : index
    %28 = vector.load %arg9[%c0_24, %c0_25] : memref<1x128xf32, #tpu.memory_space<vmem>>, vector<1x128xf32>
    %29 = vector.broadcast %28 : vector<1x128xf32> to vector<16x128xf32>
    %30 = arith.addf %27, %29 : vector<16x128xf32>
    %c0_26 = arith.constant 0 : index
    %c0_27 = arith.constant 0 : index
    %31 = vector.load %arg10[%c0_26, %c0_27] : memref<16x128xf32, #tpu.memory_space<vmem>>, vector<16x128xf32>
    tpu.vector_store %arg10[%c0_26, %c0_27], %30 {strides = array<i32>} : memref<16x128xf32, #tpu.memory_space<vmem>>, vector<16x128xf32>,
    return
  }
}

</mosaic_0001>

<bundles_post_ra>
// kernel: gcn_forward.1
= control target key start
LH: loop header
LB: loop body
LE: loop exit
PB: predicated region body
PF: predicated region fallthrough
CT: control target
= control target key end

     0   :  { %15 = vsyncpa [#allocation3], 0  ;;  %s1317_s0 = inlined_call_operand.hbm [shape: bf16[48,64], index: 0, kind: input, shape index: {}]   ;;  %s1318_s1 = inlined_call_operand.hbm [shape: bf16[32,48], index: 1, kind: input, shape index: {}]   ;;  %s1319_s2 = inlined_call_operand.hbm [shape: bf16[16,32], index: 2, kind: input, shape index: {}]   ;;  %s1320_s3 = inlined_call_operand.hbm [shape: bf16[64,128], index: 3, kind: input, shape index: {}]   ;;  %s1321_s4 = inlined_call_operand.hbm [shape: bf16[128,128], index: 4, kind: input, shape index: {}]   ;;  %s1322_s5 = inlined_call_operand.vmem [shape: f32[1,128], index: 5, kind: input, shape index: {}]   ;;  %s1323_s6 = inlined_call_operand.hbm [shape: bf16[128,128], index: 6, kind: input, shape index: {}]   ;;  %s1324_s7 = inlined_call_operand.vmem [shape: f32[1,128], index: 7, kind: input, shape index: {}]   ;;  %s1325_s8 = inlined_call_operand.hbm [shape: bf16[128,128], index: 8, kind: input, shape index: {}]   ;;  %s1326_s9 = inlined_call_operand.vmem [shape: f32[1,128], index: 9, kind: input, shape index: {}]   ;;  %s1327_s10 = inlined_call_operand.vmem [shape: f32[16,128], index: 10, kind: output, shape index: {}]  }
   0x1   :  { %16 = vsyncpa [#allocation5], 0 }
   0x2   :  { %17 = vsyncpa [#allocation8], 0 }
   0x3   :  { %18 = vsyncpa [#allocation11], 0  ;;  %s1151_s13 = smov [#allocation4]   ;;  %s1152_s15 = smov [#allocation7]  }
   0x4   :  { %s36_s14 = sshll.u32 %s1151_s13, 4  ;;  %s60_s16 = sshll.u32 %s1152_s15, 4  ;;  %s37_s14 = int_to_ptr.vmem [resolvable:$true] %s36_s14  ;;  %s61_s16 = int_to_ptr.vmem [resolvable:$true] %s60_s16 }
   0x5   :  { %s1011_s17 = scalar_lea.vmem %s37_s14, 256  ;;  %p1016_p1 = scmp.lt.s32.totalorder %s37_s14, %s37_s14 }
   0x6   :  { %p1012_p0 = scmp.ne.s32.totalorder %s37_s14, %s1011_s17  ;;  %p1017_p2 = scmp.lt.s32.totalorder %s1011_s17, %s1011_s17 }
   0x8   :  { %p1018_p3 = por %p1017_p2, %p1016_p1 }
   0xa   :  { %p1019_p4 = pnand %p1018_p3, %p1012_p0 }
   0xc   :  { %1022 = shalt.err (!%p1019_p4)
}
   0xd   :  { %s1153_s18 = smov 64   ;;  %s1154_s19 = smov 4  }
   0xe   :  { %42 = dma.hbm_to_vmem [thread:$0]  %s1318_s1, 256, %s37_s14, [#allocation5], %s1153_s18, %s1153_s18, %s1154_s19  }
   0xf   :  { %s1031_s22 = scalar_lea.vmem %s61_s16, 512  ;;  %p1036_p6 = scmp.lt.s32.totalorder %s61_s16, %s61_s16 }
  0x10   :  { %p1032_p5 = scmp.ne.s32.totalorder %s61_s16, %s1031_s22  ;;  %p1037_p7 = scmp.lt.s32.totalorder %s1031_s22, %s1031_s22 }
  0x12   :  { %p1038_p8 = por %p1037_p7, %p1036_p6 }
  0x14   :  { %p1039_p9 = pnand %p1038_p8, %p1032_p5 }
  0x16   :  { %1042 = shalt.err (!%p1039_p9)
}
  0x17   :  { %66 = dma.hbm_to_vmem [thread:$0]  %s1320_s3, 512, %s61_s16, [#allocation8], %s1153_s18, %s1153_s18, %s1154_s19  }
  0x18   :  { %s1155_s25 = smov [#allocation10]   ;;  %s1156_s27 = smov [#allocation2]  }
  0x19   :  { %s86_s26 = sshll.u32 %s1155_s25, 4  ;;  %s24_s28 = sshll.u32 %s1156_s27, 4  ;;  %s87_s26 = int_to_ptr.vmem [resolvable:$true] %s86_s26  ;;  %s25_s28 = int_to_ptr.vmem [resolvable:$true] %s24_s28 }
  0x1a   :  { %s1051_s1 = scalar_lea.vmem %s87_s26, 1024  ;;  %p1056_p11 = scmp.lt.s32.totalorder %s87_s26, %s87_s26 }
  0x1b   :  { %p1052_p10 = scmp.ne.s32.totalorder %s87_s26, %s1051_s1  ;;  %p1057_p12 = scmp.lt.s32.totalorder %s1051_s1, %s1051_s1 }
  0x1d   :  { %p1058_p13 = por %p1057_p12, %p1056_p11 }
  0x1f   :  { %p1059_p0 = pnand %p1058_p13, %p1052_p10 }
  0x21   :  { %1062 = shalt.err (!%p1059_p0)
}
  0x22   :  { %92 = dma.hbm_to_vmem [thread:$0]  %s1323_s6, 1024, %s87_s26, [#allocation11], %s1153_s18, %s1153_s18, %s1154_s19  }
  0x23   :  { %s1071_s3 = scalar_lea.vmem %s25_s28, 384  ;;  %p1076_p2 = scmp.lt.s32.totalorder %s25_s28, %s25_s28 }
  0x24   :  { %p1072_p1 = scmp.ne.s32.totalorder %s25_s28, %s1071_s3  ;;  %p1077_p3 = scmp.lt.s32.totalorder %s1071_s3, %s1071_s3 }
  0x26   :  { %p1078_p4 = por %p1077_p3, %p1076_p2 }
  0x28   :  { %p1079_p5 = pnand %p1078_p4, %p1072_p1 }
  0x2a   :  { %1082 = shalt.err (!%p1079_p5)
}
  0x2b   :  { %30 = dma.hbm_to_vmem [thread:$0]  %s1317_s0, 384, %s25_s28, [#allocation3], %s1153_s18, %s1153_s18, %s1154_s19  }
  0x2c   :  { %s1157_s13 = smov [#allocation6]   ;;  %s1158_s15 = smov [#allocation9]  }
  0x2d   :  { %s48_s14 = sshll.u32 %s1157_s13, 4  ;;  %s72_s16 = sshll.u32 %s1158_s15, 4  ;;  %s49_s14 = int_to_ptr.vmem [resolvable:$true] %s48_s14  ;;  %s73_s16 = int_to_ptr.vmem [resolvable:$true] %s72_s16 }
  0x2e   :  { %s1091_s6 = scalar_lea.vmem %s49_s14, 128  ;;  %p1096_p7 = scmp.lt.s32.totalorder %s49_s14, %s49_s14 }
  0x2f   :  { %p1092_p6 = scmp.ne.s32.totalorder %s49_s14, %s1091_s6  ;;  %p1097_p8 = scmp.lt.s32.totalorder %s1091_s6, %s1091_s6 }
  0x31   :  { %p1098_p9 = por %p1097_p8, %p1096_p7 }
  0x33   :  { %p1099_p10 = pnand %p1098_p9, %p1092_p6 }
  0x35   :  { %1102 = shalt.err (!%p1099_p10)
}
  0x36   :  { %54 = dma.hbm_to_vmem [thread:$0]  %s1319_s2, 128, %s49_s14, [#allocation5], %s1153_s18, %s1153_s18, %s1154_s19  }
  0x37   :  { %s1111_s0 = scalar_lea.vmem %s73_s16, 1024  ;;  %p1116_p12 = scmp.lt.s32.totalorder %s73_s16, %s73_s16 }
  0x38   :  { %p1112_p11 = scmp.ne.s32.totalorder %s73_s16, %s1111_s0  ;;  %p1117_p13 = scmp.lt.s32.totalorder %s1111_s0, %s1111_s0 }
  0x3a   :  { %p1118_p0 = por %p1117_p13, %p1116_p12 }
  0x3c   :  { %p1119_p1 = pnand %p1118_p0, %p1112_p11 }
  0x3e   :  { %1122 = shalt.err (!%p1119_p1)
}
  0x3f   :  { %78 = dma.hbm_to_vmem [thread:$0]  %s1321_s4, 1024, %s73_s16, [#allocation8], %s1153_s18, %s1153_s18, %s1154_s19  }
  0x40   :  { %s1159_s23 = smov [#allocation12]  }
  0x41   :  { %s100_s24 = sshll.u32 %s1159_s23, 4  ;;  %s101_s24 = int_to_ptr.vmem [resolvable:$true] %s100_s24 }
  0x42   :  { %s1131_s25 = scalar_lea.vmem %s101_s24, 1024  ;;  %p1136_p3 = scmp.lt.s32.totalorder %s101_s24, %s101_s24 }
  0x43   :  { %p1132_p2 = scmp.ne.s32.totalorder %s101_s24, %s1131_s25  ;;  %p1137_p4 = scmp.lt.s32.totalorder %s1131_s25, %s1131_s25 }
  0x45   :  { %p1138_p5 = por %p1137_p4, %p1136_p3 }
  0x47   :  { %p1139_p6 = pnand %p1138_p5, %p1132_p2 }
  0x49   :  { %1142 = shalt.err (!%p1139_p6)
}
  0x4a   :  { %106 = dma.hbm_to_vmem [thread:$0]  %s1325_s8, 1024, %s101_s24, [#allocation11], %s1153_s18, %s1153_s18, %s1154_s19  }
  0x4b   :  { %1143 = dma.done.wait [#allocation3], 384  }
  0x4c   :  { %1144 = vsyncadd [#allocation3], 4294966912 }
  0x4d   :  { %1145 = dma.done.wait [#allocation5], 384  }
  0x4e   :  { %1146 = vsyncadd [#allocation5], 4294966912 }
  0x4f   :  { %1147 = dma.done.wait [#allocation8], 1536  }
  0x50   :  { %1148 = vsyncadd [#allocation8], 4294965760 }
  0x51   :  { %1149 = dma.done.wait [#allocation11], 2048  }
  0x52   :  { %1150 = vsyncadd [#allocation11], 4294965248  ;;  %v1160_v0 = vmov 0.0   ;;  %vm1161_vm0 = vmmov 0   ;;  %v969_v1 = vld [vmem:[#allocation7 + $0x18] sm:$0xff]   ;;  %v970_v2 = vld [vmem:[#allocation7 + $0x10] sm:$0xff]  }
  0x53   :  { %852 = vmatprep.subr.bf16.mxu0 %v1160_v0  ;;  %860 = vmatprep.mubr.msk.bf16.mxu0 %vm1161_vm0, %v1160_v0  ;;  %v971_v3 = vld [vmem:[#allocation7 + $0x8] sm:$0xff]   ;;  %v976_v4 = vld [vmem:[#allocation9 + $0x38] sm:$0xff]   ;;  %v977_v5 = vld [vmem:[#allocation9 + $0x30] sm:$0xff]   ;;  %vm184_vm1 = vcmask 523264   ;;  %vm405_vm2 = vcmask 392192   ;;  %vm596_vm3 = vcmask 261120  }
  0x54   :  { %872 = vmatprep.subr.bf16.mxu1 %v1160_v0  ;;  %888 = vmatprep.mubr.msk.bf16.mxu1 %vm1161_vm0, %v1160_v0  ;;  %v972_v6 = vld [vmem:[#allocation7] sm:$0xff]   ;;  %v973_v7 = vld [vmem:[#allocation2] sm:$0xff]   ;;  %v978_v8 = vld [vmem:[#allocation9 + $0x28] sm:$0xff]  }
  0x55   :  { %853 = vmatpush3.bf16.msra.mxu0 %v969_v1  ;;  %873 = vmatpush3.bf16.msra.mxu1 %v976_v4  ;;  %v979_v9 = vld [vmem:[#allocation9 + $0x20] sm:$0xff]   ;;  %v974_v10 = vld [vmem:[#allocation2 + $0x8] sm:$0xff]   ;;  %v981_v12 = vld [vmem:[#allocation9 + $0x10] sm:$0xff]  }
  0x56   :  { %854 = vmatprep.subr.bf16.mxu0 %v1160_v0  ;;  %874 = vmatprep.subr.bf16.mxu1 %v1160_v0  ;;  %v980_v11 = vld [vmem:[#allocation9 + $0x18] sm:$0xff]   ;;  %v975_v13 = vld [vmem:[#allocation2 + $0x10] sm:$0xff]   ;;  %v982_v14 = vld [vmem:[#allocation9 + $0x8] sm:$0xff]  }
  0x57   :  { %v983_v15 = vld [vmem:[#allocation9] sm:$0xff]   ;;  %v984_v31 = vld [vmem:[#allocation4] sm:$0xff]   ;;  %v986_v32 = vld [vmem:[#allocation10 + $0x38] sm:$0xff]  }
  0x58   :  { %v987_v33 = vld [vmem:[#allocation10 + $0x30] sm:$0xff]   ;;  %v988_v34 = vld [vmem:[#allocation10 + $0x28] sm:$0xff]   ;;  %v989_v35 = vld [vmem:[#allocation10 + $0x20] sm:$0xff]  }
  0x59   :  { %855 = vmatpush3.bf16.msra.mxu0 %v970_v2  ;;  %875 = vmatpush3.bf16.msra.mxu1 %v977_v5  ;;  %v990_v36 = vld [vmem:[#allocation10 + $0x18] sm:$0xff]   ;;  %v991_v37 = vld [vmem:[#allocation10 + $0x10] sm:$0xff]   ;;  %v992_v4 = vld [vmem:[#allocation10 + $0x8] sm:$0xff]  }
  0x5a   :  { %856 = vmatprep.subr.bf16.mxu0 %v1160_v0  ;;  %876 = vmatprep.subr.bf16.mxu1 %v1160_v0  ;;  %v774_v47 = vld [vmem:[%s1322_s5] ss:$0 sm:$0xff]  ;;  %v993_v5 = vld [vmem:[#allocation10] sm:$0xff]  }
  0x5d   :  { %857 = vmatpush3.bf16.msra.mxu0 %v971_v3  ;;  %877 = vmatpush3.bf16.msra.mxu1 %v978_v8  ;;  %v985_v3 = vld [vmem:[#allocation4 + $0x8] sm:$0xff]  }
  0x5e   :  { %858 = vmatprep.subr.bf16.mxu0 %v1160_v0  ;;  %878 = vmatprep.subr.bf16.mxu1 %v1160_v0 }
  0x61   :  { %859 = vmatpush3.bf16.msra.mxu0 %v972_v6  ;;  %879 = vmatpush3.bf16.msra.mxu1 %v979_v9 }
  0x62   :  { %880 = vmatprep.subr.bf16.mxu1 %v1160_v0 }
  0x64   :  { %861 = vmatmul.mubr.msk.bf16.vlgmr.msra.gmra.mxu0 %vm184_vm1, %v973_v7 }
  0x65   :  { %864 = vmatprep.mubr.msk.bf16.mxu0 %vm1161_vm0, %v1160_v0  ;;  %881 = vmatpush3.bf16.msra.mxu1 %v980_v11 }
  0x66   :  { %882 = vmatprep.subr.bf16.mxu1 %v1160_v0 }
  0x69   :  { %883 = vmatpush3.bf16.msra.mxu1 %v981_v12  ;;  %v995_v12 = vld [vmem:[#allocation12 + $0x38] sm:$0xff]  }
  0x6a   :  { %884 = vmatprep.subr.bf16.mxu1 %v1160_v0 }
  0x6c   :  { %865 = vmatmul.mubr.msk.bf16.gmra.mxu0 %vm184_vm1, %v974_v10 }
  0x6d   :  { %868 = vmatprep.mubr.msk.bf16.mxu0 %vm1161_vm0, %v1160_v0  ;;  %885 = vmatpush3.bf16.msra.mxu1 %v982_v14  ;;  %v997_v14 = vld [vmem:[#allocation12 + $0x28] sm:$0xff]  }
  0x6e   :  { %886 = vmatprep.subr.bf16.mxu1 %v1160_v0 }
  0x71   :  { %887 = vmatpush3.bf16.msra.mxu1 %v983_v15  ;;  %v998_v15 = vld [vmem:[#allocation12 + $0x20] sm:$0xff]  }
  0x72   :  { %910 = vmatprep.subr.bf16.mxu1 %v986_v32 }
  0x74   :  { %869 = vmatmul.mubr.msk.bf16.gmra.mxu0 %vm184_vm1, %v975_v13  ;;  %v996_v13 = vld [vmem:[#allocation12 + $0x30] sm:$0xff]  }
  0x75   :  { %906 = vmatprep.mubr.msk.bf16.mxu0 %vm405_vm2, %v984_v31 }
 0x124   :  { %v228_v16 = vpop.f32.mrf.mxu0 }
 0x126   :  { %v862_v17 = vpop.f32.mrf.mxu0 }
 0x127   :  { %v1000_v17 = vld [vmem:[#allocation12 + $0x10] sm:$0xff]  }
 0x128   :  { %v231_v18 = vpop.f32.mrf.mxu0 }
 0x129   :  { %v251_v19 = vpack.c.bf16 %v231_v18, %v228_v16  ;;  %v999_v16 = vld [vmem:[#allocation12 + $0x18] sm:$0xff]  }
 0x12a   :  { %v863_v20 = vpop.f32.mrf.mxu0 }
 0x12b   :  { %889 = vmatmul.mubr.bf16.vlgmr.msra.gmra.mxu1 %v251_v19  ;;  %v787_v19 = vld [vmem:[%s1324_s7] ss:$0 sm:$0xff] }
 0x12c   :  { %v236_v21 = vpop.f32.mrf.mxu0  ;;  %892 = vmatprep.mubr.msk.bf16.mxu1 %vm1161_vm0, %v1160_v0  ;;  %911 = vmatpush3.bf16.msra.mxu1 %v986_v32 }
 0x12d   :  { %912 = vmatprep.subr.bf16.mxu1 %v987_v33 }
 0x12e   :  { %v866_v22 = vpop.f32.mrf.mxu0 }
 0x130   :  { %v239_v23 = vpop.f32.mrf.mxu0  ;;  %913 = vmatpush3.bf16.msra.mxu1 %v987_v33  ;;  %v994_v33 = vld [vmem:[#allocation6] sm:$0xff]  }
 0x131   :  { %v252_v24 = vpack.c.bf16 %v239_v23, %v236_v21  ;;  %914 = vmatprep.subr.bf16.mxu1 %v988_v34 }
 0x132   :  { %v867_v25 = vpop.f32.mrf.mxu0 }
 0x133   :  { %893 = vmatmul.mubr.bf16.gmra.mxu1 %v252_v24 }
 0x134   :  { %v244_v26 = vpop.f32.mrf.mxu0  ;;  %896 = vmatprep.mubr.msk.bf16.mxu1 %vm1161_vm0, %v1160_v0  ;;  %915 = vmatpush3.bf16.msra.mxu1 %v988_v34  ;;  %v1001_v34 = vld [vmem:[#allocation12 + $0x8] sm:$0xff]  }
 0x135   :  { %916 = vmatprep.subr.bf16.mxu1 %v989_v35 }
 0x136   :  { %v870_v27 = vpop.f32.mrf.mxu0 }
 0x138   :  { %v247_v28 = vpop.f32.mrf.mxu0  ;;  %917 = vmatpush3.bf16.msra.mxu1 %v989_v35  ;;  %v1002_v35 = vld [vmem:[#allocation12] sm:$0xff]  }
 0x139   :  { %v253_v29 = vpack.c.bf16 %v247_v28, %v244_v26  ;;  %918 = vmatprep.subr.bf16.mxu1 %v990_v36 }
 0x13a   :  { %v871_v30 = vpop.f32.mrf.mxu0 }
 0x13b   :  { %897 = vmatmul.mubr.bf16.gmra.mxu1 %v253_v29 }
 0x13c   :  { %919 = vmatpush3.bf16.msra.mxu1 %v990_v36 }
 0x13d   :  { %920 = vmatprep.subr.bf16.mxu1 %v991_v37 }
 0x140   :  { %921 = vmatpush3.bf16.msra.mxu1 %v991_v37 }
 0x141   :  { %922 = vmatprep.subr.bf16.mxu1 %v992_v4 }
 0x144   :  { %923 = vmatpush3.bf16.msra.mxu1 %v992_v4 }
 0x145   :  { %924 = vmatprep.subr.bf16.mxu1 %v993_v5 }
 0x148   :  { %925 = vmatpush3.bf16.msra.mxu1 %v993_v5 }
 0x149   :  { %930 = vmatprep.subr.bf16.mxu1 %v1160_v0 }
 0x1eb   :  { %v359_v38 = vpop.f32.mrf.mxu1 }
 0x1ec   :  { %v360_v59 = vadd.f32 %v774_v47, %v359_v38 }
 0x1ed   :  { %v890_v39 = vpop.f32.mrf.mxu1 }
 0x1ee   :  { %v382_v1 = vmax.f32 %v360_v59, 0.0 }
 0x1ef   :  { %v362_v40 = vpop.f32.mrf.mxu1 }
 0x1f0   :  { %v363_v55 = vadd.f32 %v774_v47, %v362_v40 }
 0x1f1   :  { %v891_v41 = vpop.f32.mrf.mxu1 }
 0x1f2   :  { %v383_v62 = vmax.f32 %v363_v55, 0.0  ;;  %v798_v41 = vld [vmem:[%s1326_s9] ss:$0 sm:$0xff] }
 0x1f3   :  { %v367_v42 = vpop.f32.mrf.mxu1 }
 0x1f4   :  { %v368_v52 = vadd.f32 %v774_v47, %v367_v42  ;;  %v388_v2 = vpack.c.bf16 %v383_v62, %v382_v1 }
 0x1f5   :  { %v894_v43 = vpop.f32.mrf.mxu1 }
 0x1f6   :  { %v384_v60 = vmax.f32 %v368_v52, 0.0 }
 0x1f7   :  { %v370_v44 = vpop.f32.mrf.mxu1 }
 0x1f8   :  { %v371_v49 = vadd.f32 %v774_v47, %v370_v44 }
 0x1f9   :  { %v895_v45 = vpop.f32.mrf.mxu1 }
 0x1fa   :  { %v385_v56 = vmax.f32 %v371_v49, 0.0 }
 0x1fb   :  { %v375_v46 = vpop.f32.mrf.mxu1 }
 0x1fc   :  { %v376_v50 = vadd.f32 %v774_v47, %v375_v46  ;;  %v389_v63 = vpack.c.bf16 %v385_v56, %v384_v60 }
 0x1fd   :  { %v898_v48 = vpop.f32.mrf.mxu1 }
 0x1fe   :  { %v386_v57 = vmax.f32 %v376_v50, 0.0 }
 0x1ff   :  { %v378_v51 = vpop.f32.mrf.mxu1 }
 0x200   :  { %v379_v53 = vadd.f32 %v774_v47, %v378_v51 }
 0x201   :  { %v899_v54 = vpop.f32.mrf.mxu1 }
 0x202   :  { %v387_v58 = vmax.f32 %v379_v53, 0.0 }
 0x204   :  { %v390_v61 = vpack.c.bf16 %v387_v58, %v386_v57 }
 0x206   :  { %900 = vmatprep.subr.bf16.mxu0 %v390_v61 }
 0x207   :  { %901 = vmatpush3.bf16.msra.mxu0 %v390_v61 }
 0x208   :  { %902 = vmatprep.subr.bf16.mxu0 %v389_v63 }
 0x20b   :  { %903 = vmatpush3.bf16.msra.mxu0 %v389_v63 }
 0x20c   :  { %904 = vmatprep.subr.bf16.mxu0 %v388_v2 }
 0x20f   :  { %905 = vmatpush3.bf16.msra.mxu0 %v388_v2 }
 0x210   :  { %938 = vmatprep.subr.bf16.mxu0 %v1160_v0 }
 0x212   :  { %907 = vmatmul.mubr.msk.bf16.vlgmr.msra.gmra.mxu0 %vm405_vm2, %v985_v3 }
 0x213   :  { %954 = vmatprep.mubr.msk.bf16.mxu0 %vm1161_vm0, %v1160_v0  ;;  %939 = vmatpush3.bf16.msra.mxu0 %v995_v12 }
 0x214   :  { %940 = vmatprep.subr.bf16.mxu0 %v1160_v0 }
 0x217   :  { %941 = vmatpush3.bf16.msra.mxu0 %v996_v13 }
 0x218   :  { %942 = vmatprep.subr.bf16.mxu0 %v1160_v0 }
 0x21b   :  { %943 = vmatpush3.bf16.msra.mxu0 %v997_v14 }
 0x21c   :  { %944 = vmatprep.subr.bf16.mxu0 %v1160_v0 }
 0x21f   :  { %945 = vmatpush3.bf16.msra.mxu0 %v998_v15 }
 0x220   :  { %946 = vmatprep.subr.bf16.mxu0 %v1160_v0 }
 0x223   :  { %947 = vmatpush3.bf16.msra.mxu0 %v999_v16 }
 0x224   :  { %948 = vmatprep.subr.bf16.mxu0 %v1160_v0 }
 0x227   :  { %949 = vmatpush3.bf16.msra.mxu0 %v1000_v17 }
 0x228   :  { %950 = vmatprep.subr.bf16.mxu0 %v1160_v0 }
 0x22b   :  { %951 = vmatpush3.bf16.msra.mxu0 %v1001_v34 }
 0x22c   :  { %952 = vmatprep.subr.bf16.mxu0 %v1160_v0 }
 0x22f   :  { %953 = vmatpush3.bf16.msra.mxu0 %v1002_v35 }
 0x2d2   :  { %v908_v6 = vpop.f32.mrf.mxu0 }
 0x2d4   :  { %v446_v7 = vpop.f32.mrf.mxu0 }
 0x2d6   :  { %v909_v8 = vpop.f32.mrf.mxu0 }
 0x2d7   :  { %v462_v11 = vpack.c.bf16 %v909_v8, %v908_v6 }
 0x2d8   :  { %v449_v9 = vpop.f32.mrf.mxu0 }
 0x2d9   :  { %v461_v10 = vpack.c.bf16 %v449_v9, %v446_v7 }
 0x2db   :  { %926 = vmatprep.mubr.bf16.mxu1 %v461_v10 }
 0x2dc   :  { %927 = vmatmul.mubr.bf16.vlgmr.msra.gmra.mxu1 %v462_v11 }
 0x2dd   :  { %934 = vmatprep.mubr.msk.bf16.mxu1 %vm1161_vm0, %v1160_v0 }
 0x39c   :  { %v928_v18 = vpop.f32.mrf.mxu1 }
 0x39d   :  { %v577_v21 = vadd.f32 %v928_v18, %v787_v19 }
 0x39e   :  { %v568_v20 = vpop.f32.mrf.mxu1 }
 0x39f   :  { %v585_v25 = vmax.f32 %v577_v21, 0.0  ;;  %v569_v26 = vadd.f32 %v787_v19, %v568_v20 }
 0x3a0   :  { %v929_v22 = vpop.f32.mrf.mxu1 }
 0x3a1   :  { %v580_v23 = vadd.f32 %v929_v22, %v787_v19  ;;  %v583_v31 = vmax.f32 %v569_v26, 0.0 }
 0x3a2   :  { %v571_v24 = vpop.f32.mrf.mxu1 }
 0x3a3   :  { %v586_v27 = vmax.f32 %v580_v23, 0.0  ;;  %v572_v28 = vadd.f32 %v787_v19, %v571_v24 }
 0x3a5   :  { %v588_v29 = vpack.c.bf16 %v586_v27, %v585_v25  ;;  %v584_v30 = vmax.f32 %v572_v28, 0.0 }
 0x3a7   :  { %931 = vmatpush3.bf16.msra.mxu1 %v588_v29  ;;  %v587_v32 = vpack.c.bf16 %v584_v30, %v583_v31 }
 0x3a8   :  { %932 = vmatprep.subr.bf16.mxu1 %v1160_v0 }
 0x3ab   :  { %933 = vmatpush3.bf16.msra.mxu1 %v587_v32 }
 0x3ae   :  { %935 = vmatmul.mubr.msk.bf16.vlgmr.msra.gmra.mxu1 %vm596_vm3, %v994_v33 }
 0x46e   :  { %v634_v36 = vpop.f32.mrf.mxu1 }
 0x470   :  { %v936_v37 = vpop.f32.mrf.mxu1 }
 0x472   :  { %v637_v38 = vpop.f32.mrf.mxu1 }
 0x473   :  { %v641_v39 = vpack.c.bf16 %v637_v38, %v634_v36 }
 0x474   :  { %v937_v40 = vpop.f32.mrf.mxu1 }
 0x475   :  { %955 = vmatmul.mubr.bf16.vlgmr.msra.gmra.mxu0 %v641_v39 }
 0x535   :  { %v747_v42 = vpop.f32.mrf.mxu0 }
 0x536   :  { %v748_v43 = vadd.f32 %v798_v41, %v747_v42 }
 0x537   :  { %v956_v44 = vpop.f32.mrf.mxu0 }
 0x538   :  { %754 = vst [vmem:[%s1327_s10] sm:$0xff] %v748_v43 }
 0x539   :  { %v750_v0 = vpop.f32.mrf.mxu0 }
 0x53a   :  { %v751_v45 = vadd.f32 %v798_v41, %v750_v0 }
 0x53b   :  { %v957_v46 = vpop.f32.mrf.mxu0 }
 0x53c   :  { %755 = vst [vmem:[%s1327_s10 + $0x8] sm:$0xff] %v751_v45 }
 0x53d   :  { %760 = vsyncpa [#allocation3], 1 }
 0x53e   :  { %761 = vsyncpa [#allocation5], 1 }
 0x53f   :  { %762 = vsyncpa [#allocation8], 1 }
 0x540   :  { %763 = vsyncpa [#allocation11], 1 }

</bundles_post_ra>
